<compile_context>
chip_gen: v7x
topology: tpu7x:2x2x1
jax: 0.10.0
libtpu: 0.0.40
codegen_flags: <defaults>
</compile_context>

<pallas_src>
import functools

import jax
import jax.numpy as jnp
from jax.experimental import pallas as pl
from jax.experimental.pallas import tpu as pltpu


def _round_up(x: int, m: int) -> int:
    return (x + m - 1) // m * m


def _pick_tile(n_pad: int, cap: int) -> int:
    """Largest multiple of 128 <= cap that divides n_pad (n_pad % 128 == 0)."""
    t = (min(cap, n_pad) // 128) * 128
    while t > 128 and n_pad % t != 0:
        t -= 128
    return max(t, 128)


def fused_gcn_kernel(a_ref, x_hbm, w_ref, b_ref, o_ref,
                     h_ref, xw_ref, xtile_ref, *,
                     num_layers: int, num_classes: int, tm: int, tk: int):
    l = pl.program_id(0)            # layer
    i = pl.program_id(1)            # node-row tile
    k = pl.program_id(2)            # aggregation (column) tile of a_hat
    nk = pl.num_programs(2)

    k_off = pl.multiple_of(k * tk, tk)
    i_off = pl.multiple_of(i * tm, tm)

    # ---- incremental XW: at i == 0, produce the k-th row tile of XW_l -------
    # Layer 0: the layer input is X, which lives in HBM; DMA just the needed
    # row tile (read exactly once over the whole kernel).
    @pl.when((i == 0) & (l == 0))
    def _():
        pltpu.sync_copy(x_hbm.at[pl.ds(k_off, tk)], xtile_ref)
        xw_ref[pl.ds(k_off, tk), :] = jnp.dot(
            xtile_ref[...], w_ref[...],
            preferred_element_type=jnp.float32).astype(jnp.bfloat16)

    # Layers > 0: the layer input is the resident bf16 H scratch.
    @pl.when((i == 0) & (l > 0))
    def _():
        xw_ref[pl.ds(k_off, tk), :] = jnp.dot(
            h_ref[pl.ds(k_off, tk), :], w_ref[...],
            preferred_element_type=jnp.float32).astype(jnp.bfloat16)

    # ---- aggregation: accumulate straight into the f32 output block ---------
    @pl.when(k == 0)
    def _():
        o_ref[...] = jnp.zeros_like(o_ref)

    o_ref[...] += jnp.dot(a_ref[...], xw_ref[pl.ds(k_off, tk), :],
                          preferred_element_type=jnp.float32)

    # ---- finalize the row tile on the last reduction step --------------------
    @pl.when((k == nk - 1) & (l < num_layers - 1))
    def _():
        h = jnp.maximum(o_ref[...] + b_ref[...], 0.0)     # bias + ReLU (f32)
        # (dropout = identity in eval mode)
        h_ref[pl.ds(i_off, tm), :] = h.astype(jnp.bfloat16)  # next layer input

    @pl.when((k == nk - 1) & (l == num_layers - 1))
    def _():
        logits = o_ref[...] + b_ref[...]
        # Mask padded class columns, then numerically stable log_softmax.
        col = jax.lax.broadcasted_iota(jnp.int32, logits.shape, 1)
        logits = jnp.where(col < num_classes, logits, -1e30)
        m = jnp.max(logits, axis=-1, keepdims=True)
        s = logits - m
        lse = jnp.log(jnp.sum(jnp.exp(s), axis=-1, keepdims=True))
        o_ref[...] = s - lse


def prepare_gcn_inputs(a_hat, x, params):
    """Pad + cast once (hoisted out of the per-forward path)."""
    n, f_in = x.shape
    num_layers = len(params)
    f_dims = [f_in] + [w.shape[1] for (w, _) in params]
    f_pad = _round_up(max(f_dims), 128)          # lane-dense feature dim
    n_pad = _round_up(n, 128)                    # decoupled from the tile size

    a_p = jnp.zeros((n_pad, n_pad), jnp.bfloat16).at[:n, :n].set(
        a_hat.astype(jnp.bfloat16))
    x_p = jnp.zeros((n_pad, f_pad), jnp.bfloat16).at[:n, :f_in].set(
        x.astype(jnp.bfloat16))
    w_all = jnp.zeros((num_layers, f_pad, f_pad), jnp.bfloat16)
    b_all = jnp.zeros((num_layers, 1, f_pad), jnp.float32)
    for layer, (w, b) in enumerate(params):
        w_all = w_all.at[layer, :w.shape[0], :w.shape[1]].set(
            w.astype(jnp.bfloat16))
        b_all = b_all.at[layer, :, :b.shape[1]].set(b.astype(jnp.float32))
    return a_p, x_p, w_all, b_all


def gcn_forward_padded(a_p, x_p, w_all, b_all, n, num_classes,
                       *, row_tile_cap=512, col_tile_cap=1024):
    """Full GCN stack in one fused pallas_call on pre-padded inputs.

    Returns [n, num_classes] float32 log-probabilities.
    """
    n_pad, f_pad = x_p.shape
    num_layers = int(w_all.shape[0])

    tm = _pick_tile(n_pad, row_tile_cap)         # a_hat row tile
    tk = _pick_tile(n_pad, col_tile_cap)         # a_hat column (reduction) tile
    ni, nk = n_pad // tm, n_pad // tk

    # Explicit VMEM budget: resident H + XW + staging tile + double-buffered
    # a_hat / output / weight / bias blocks (+ headroom).
    vmem_needed = (
        2 * n_pad * f_pad * 2        # h_ref + xw_ref (bf16, resident)
        + tk * f_pad * 2             # X staging tile (bf16)
        + 2 * tm * tk * 2            # double-buffered a_hat tiles (bf16)
        + 2 * tm * f_pad * 4         # double-buffered output tiles (f32)
        + 2 * f_pad * f_pad * 2      # double-buffered W (bf16)
        + 2 * f_pad * 4              # double-buffered bias (f32)
    )
    vmem_limit = int(min(max(vmem_needed + (4 << 20), 32 << 20), 48 << 20))

    kernel = functools.partial(
        fused_gcn_kernel, num_layers=num_layers, num_classes=num_classes,
        tm=tm, tk=tk)

    out_p = pl.pallas_call(
        kernel,
        out_shape=jax.ShapeDtypeStruct((n_pad, f_pad), jnp.float32),
        grid=(num_layers, ni, nk),
        in_specs=[
            # streamed a_hat tile
            pl.BlockSpec((tm, tk), lambda l, i, k: (i, k)),
            # X stays in HBM; only layer-0 k-tiles are DMA'd manually
            pl.BlockSpec(memory_space=pl.ANY),
            # per-layer weight / bias (layer dim squeezed)
            pl.BlockSpec((None, f_pad, f_pad), lambda l, i, k: (l, 0, 0)),
            pl.BlockSpec((None, 1, f_pad), lambda l, i, k: (l, 0, 0)),
        ],
        out_specs=pl.BlockSpec((tm, f_pad), lambda l, i, k: (i, 0)),
        scratch_shapes=[
            pltpu.VMEM((n_pad, f_pad), jnp.bfloat16),    # H (layer input, bf16)
            pltpu.VMEM((n_pad, f_pad), jnp.bfloat16),    # XW (resident, bf16)
            pltpu.VMEM((tk, f_pad), jnp.bfloat16),       # X staging tile
        ],
        compiler_params=pltpu.CompilerParams(
            # Layers / rows / cols all carry state through VMEM scratch
            # (H, XW, output accumulator) -> sequential on one core.
            dimension_semantics=("arbitrary", "arbitrary", "arbitrary"),
            vmem_limit_bytes=vmem_limit),
    )(a_p, x_p, w_all, b_all)

    return out_p[:n, :num_classes]


def net_forward_pallas(a_hat, x, params, num_classes):
    """Convenience one-shot wrapper (prepare + run)."""
    a_p, x_p, w_all, b_all = prepare_gcn_inputs(a_hat, x, params)
    return gcn_forward_padded(a_p, x_p, w_all, b_all, x.shape[0], num_classes)


# ------------------------------ glue / reference -----------------------------

def build_normalized_adjacency(edge_index, num_nodes):
    """Dense D^-1/2 (A + I) D^-1/2 matching GCNConv(normalize=True,
    add_self_loops=True) with unit edge weights."""
    src = edge_index[0]
    dst = edge_index[1]
    a = jnp.zeros((num_nodes, num_nodes), jnp.float32)
    a = a.at[dst, src].add(1.0)                           # message src -> dst
    a = a + jnp.eye(num_nodes, dtype=jnp.float32)         # self loops
    deg = a.sum(axis=1)
    d_inv_sqrt = jnp.where(deg > 0, 1.0 / jnp.sqrt(deg), 0.0)
    return d_inv_sqrt[:, None] * a * d_inv_sqrt[None, :]


def init_params(key, num_features, num_classes, hidden_channels, num_layers):
    dims = ([num_features]
            + [hidden_channels] * (num_layers - 1)
            + [num_classes])
    params = []
    for layer in range(num_layers):
        fan_in, fan_out = dims[layer], dims[layer + 1]
        key, wkey, bkey = jax.random.split(key, 3)
        limit = jnp.sqrt(6.0 / (fan_in + fan_out))        # glorot uniform
        w = jax.random.uniform(wkey, (fan_in, fan_out), jnp.float32,
                               -limit, limit)
        # PyG default init is zeros; use small random bias to exercise the
        # bias-add path in the numeric check (forward math is identical).
        b = 0.1 * jax.random.normal(bkey, (1, fan_out), jnp.float32)
        params.append((w, b))
    return params


def reference_forward(a_hat, x, params, *, bf16_inputs):
    """Pure-JAX reference; bf16_inputs=True mimics the kernel's MXU numerics."""
    num_layers = len(params)
    h = x
    a = a_hat.astype(jnp.bfloat16) if bf16_inputs else a_hat
    for layer, (w, b) in enumerate(params):
        if bf16_inputs:
            xw = jnp.dot(h.astype(jnp.bfloat16), w.astype(jnp.bfloat16),
                         preferred_element_type=jnp.float32).astype(jnp.bfloat16)
            h = jnp.dot(a, xw, preferred_element_type=jnp.float32) + b
        else:
            h = a @ (h @ w) + b
        if layer < num_layers - 1:
            h = jnp.maximum(h, 0.0)
    return jax.nn.log_softmax(h, axis=1)


if __name__ == "__main__":
    # small, forward-consistent shapes
    N = 16                 # nodes
    NUM_FEATURES = 8
    HIDDEN_CHANNELS = 32
    NUM_CLASSES = 4
    NUM_LAYERS = 3

    key = jax.random.PRNGKey(0)
    key, xkey, pkey = jax.random.split(key, 3)

    # node features
    x = jax.random.normal(xkey, (N, NUM_FEATURES), jnp.float32)

    # deterministic undirected ring graph: edges i <-> (i+1) mod N
    src = jnp.arange(N, dtype=jnp.int32)
    dst = (src + 1) % N
    edge_index = jnp.stack(
        [jnp.concatenate([src, dst]), jnp.concatenate([dst, src])], axis=0)

    a_hat = build_normalized_adjacency(edge_index, N)
    params = init_params(pkey, NUM_FEATURES, NUM_CLASSES,
                         HIDDEN_CHANNELS, NUM_LAYERS)

    # Pad / cast once (hoisted out of the per-call path), then run the fused
    # kernel through jit with n / num_classes static.
    a_p, x_p, w_all, b_all = prepare_gcn_inputs(a_hat, x, params)
    fwd = jax.jit(gcn_forward_padded, static_argnums=(4, 5))
    out = fwd(a_p, x_p, w_all, b_all, N, NUM_CLASSES)
    out = jax.block_until_ready(out)

    assert out.shape == (N, NUM_CLASSES)
    assert bool(jnp.all(jnp.isfinite(out)))

    # bit-for-bit-ish check against a reference using the same bf16 MXU inputs
    ref_bf16 = reference_forward(a_hat, x, params, bf16_inputs=True)
    assert jnp.allclose(out, ref_bf16, atol=2e-3, rtol=2e-3), (
        jnp.max(jnp.abs(out - ref_bf16)))

    # looser semantic check against the pure-f32 math of the original module
    ref_f32 = reference_forward(a_hat, x, params, bf16_inputs=False)
    assert jnp.allclose(out, ref_f32, atol=1e-1, rtol=1e-1), (
        jnp.max(jnp.abs(out - ref_f32)))

    print("KERNEL_OK")
</pallas_src>

<mosaic_0001>
module attributes {stable_mosaic.version = 11 : i64} {
  func.func @fused_gcn_kernel(%arg0: i32, %arg1: i32, %arg2: i32, %arg3: memref<128x128xbf16, #tpu.memory_space<vmem>>, %arg4: memref<128x128xbf16, #tpu.memory_space<any>>, %arg5: memref<1x128x128xbf16, #tpu.memory_space<vmem>>, %arg6: memref<1x1x128xf32, #tpu.memory_space<vmem>>, %arg7: memref<128x128xf32, #tpu.memory_space<vmem>>, %arg8: memref<128x128xbf16, #tpu.memory_space<vmem>>, %arg9: memref<128x128xbf16, #tpu.memory_space<vmem>>, %arg10: memref<128x128xbf16, #tpu.memory_space<vmem>>) attributes {dimension_semantics = [#tpu.dimension_semantics<arbitrary>, #tpu.dimension_semantics<arbitrary>, #tpu.dimension_semantics<arbitrary>], iteration_bounds = array<i64: 3, 1, 1>, scalar_prefetch = 0 : i64, scratch_operands = 3 : i64, tpu.core_type = #tpu.core_type<tc>, window_params = [{transform_indices = @transform_0, window_bounds = array<i64: 128, 128>}, {}, {transform_indices = @transform_2, window_bounds = array<i64: 1, 128, 128>}, {transform_indices = @transform_3, window_bounds = array<i64: 1, 1, 128>}, {transform_indices = @transform_4, window_bounds = array<i64: 128, 128>}]} {
    %c128_i32 = arith.constant 128 : i32
    %0 = arith.muli %arg2, %c128_i32 : i32
    %1 = tpu.assume_multiple %0, 128 : i32
    %c128_i32_0 = arith.constant 128 : i32
    %2 = arith.muli %arg1, %c128_i32_0 : i32
    %3 = tpu.assume_multiple %2, 128 : i32
    %c0_i32 = arith.constant 0 : i32
    %4 = arith.cmpi eq, %arg1, %c0_i32 : i32
    %c0_i32_1 = arith.constant 0 : i32
    %5 = arith.cmpi eq, %arg0, %c0_i32_1 : i32
    %6 = arith.andi %4, %5 : i1
    %7 = arith.extui %6 : i1 to i32
    %c0_i32_2 = arith.constant 0 : i32
    %8 = arith.cmpi ne, %7, %c0_i32_2 : i32
    scf.if %8 {
      "tpu.region"() ({
        %41 = tpu.sem_alloc : memref<!tpu.dma_semaphore, #tpu.memory_space<semaphore_mem>>
        %c0_i32_26 = arith.constant 0 : i32
        %42 = tpu.memref_slice %arg4[%1, %c0_i32_26] : memref<128x128xbf16, #tpu.memory_space<any>> -> memref<128x128xbf16, #tpu.memory_space<any>>
        tpu.enqueue_dma source(%42 : memref<128x128xbf16, #tpu.memory_space<any>>) target(%arg10 : memref<128x128xbf16, #tpu.memory_space<vmem>>) target_semaphore(%41 : memref<!tpu.dma_semaphore, #tpu.memory_space<semaphore_mem>>)
        %c0_i32_27 = arith.constant 0 : i32
        %43 = tpu.memref_slice %arg4[%1, %c0_i32_27] : memref<128x128xbf16, #tpu.memory_space<any>> -> memref<128x128xbf16, #tpu.memory_space<any>>
        tpu.wait_dma2 semaphore(%41 : memref<!tpu.dma_semaphore, #tpu.memory_space<semaphore_mem>>) src(%43 : memref<128x128xbf16, #tpu.memory_space<any>>) dst(%arg10 : memref<128x128xbf16, #tpu.memory_space<vmem>>)
        tpu.yield
      }) : () -> ()
      %c0_19 = arith.constant 0 : index
      %c0_20 = arith.constant 0 : index
      %34 = vector.load %arg10[%c0_19, %c0_20] : memref<128x128xbf16, #tpu.memory_space<vmem>>, vector<128x128xbf16>
      %c0_21 = arith.constant 0 : index
      %c0_22 = arith.constant 0 : index
      %c0_23 = arith.constant 0 : index
      %35 = vector.load %arg5[%c0_21, %c0_22, %c0_23] : memref<1x128x128xbf16, #tpu.memory_space<vmem>>, vector<1x128x128xbf16>
      %36 = vector.shape_cast %35 : vector<1x128x128xbf16> to vector<128x128xbf16>
      %cst_24 = arith.constant dense<0.000000e+00> : vector<128x128xf32>
      %37 = tpu.matmul %34, %36, %cst_24 {dimension_numbers = #tpu.dot_dimension_numbers<[1], [0], [0], [1], [0, 0, 1, 1], [], []>} : vector<128x128xbf16>, vector<128x128xbf16>, vector<128x128xf32> -> vector<128x128xf32>
      %38 = arith.truncf %37 : vector<128x128xf32> to vector<128x128xbf16>
      %39 = arith.index_cast %1 : i32 to index
      %c0_25 = arith.constant 0 : index
      %40 = vector.load %arg9[%39, %c0_25] : memref<128x128xbf16, #tpu.memory_space<vmem>>, vector<128x128xbf16>
      tpu.vector_store %arg9[%39, %c0_25], %38 {strides = array<i32>} : memref<128x128xbf16, #tpu.memory_space<vmem>>, vector<128x128xbf16>,
    } else {
    }
    %c0_i32_3 = arith.constant 0 : i32
    %9 = arith.cmpi eq, %arg1, %c0_i32_3 : i32
    %c0_i32_4 = arith.constant 0 : i32
    %10 = arith.cmpi sgt, %arg0, %c0_i32_4 : i32
    %11 = arith.andi %9, %10 : i1
    %12 = arith.extui %11 : i1 to i32
    %c0_i32_5 = arith.constant 0 : i32
    %13 = arith.cmpi ne, %12, %c0_i32_5 : i32
    scf.if %13 {
      %34 = arith.index_cast %1 : i32 to index
      %c0_19 = arith.constant 0 : index
      %35 = vector.load %arg8[%34, %c0_19] : memref<128x128xbf16, #tpu.memory_space<vmem>>, vector<128x128xbf16>
      %c0_20 = arith.constant 0 : index
      %c0_21 = arith.constant 0 : index
      %c0_22 = arith.constant 0 : index
      %36 = vector.load %arg5[%c0_20, %c0_21, %c0_22] : memref<1x128x128xbf16, #tpu.memory_space<vmem>>, vector<1x128x128xbf16>
      %37 = vector.shape_cast %36 : vector<1x128x128xbf16> to vector<128x128xbf16>
      %cst_23 = arith.constant dense<0.000000e+00> : vector<128x128xf32>
      %38 = tpu.matmul %35, %37, %cst_23 {dimension_numbers = #tpu.dot_dimension_numbers<[1], [0], [0], [1], [0, 0, 1, 1], [], []>} : vector<128x128xbf16>, vector<128x128xbf16>, vector<128x128xf32> -> vector<128x128xf32>
      %39 = arith.truncf %38 : vector<128x128xf32> to vector<128x128xbf16>
      %40 = arith.index_cast %1 : i32 to index
      %c0_24 = arith.constant 0 : index
      %41 = vector.load %arg9[%40, %c0_24] : memref<128x128xbf16, #tpu.memory_space<vmem>>, vector<128x128xbf16>
      tpu.vector_store %arg9[%40, %c0_24], %39 {strides = array<i32>} : memref<128x128xbf16, #tpu.memory_space<vmem>>, vector<128x128xbf16>,
    } else {
    }
    %c0_i32_6 = arith.constant 0 : i32
    %14 = arith.cmpi eq, %arg2, %c0_i32_6 : i32
    %15 = arith.extui %14 : i1 to i32
    %c0_i32_7 = arith.constant 0 : i32
    %16 = arith.cmpi ne, %15, %c0_i32_7 : i32
    scf.if %16 {
      %cst_19 = arith.constant 0.000000e+00 : f32
      %34 = vector.broadcast %cst_19 : f32 to vector<128x128xf32>
      %c0_20 = arith.constant 0 : index
      %c0_21 = arith.constant 0 : index
      %35 = vector.load %arg7[%c0_20, %c0_21] : memref<128x128xf32, #tpu.memory_space<vmem>>, vector<128x128xf32>
      tpu.vector_store %arg7[%c0_20, %c0_21], %34 {strides = array<i32>} : memref<128x128xf32, #tpu.memory_space<vmem>>, vector<128x128xf32>,
    } else {
    }
    %c0 = arith.constant 0 : index
    %c0_8 = arith.constant 0 : index
    %17 = vector.load %arg7[%c0, %c0_8] : memref<128x128xf32, #tpu.memory_space<vmem>>, vector<128x128xf32>
    %c0_9 = arith.constant 0 : index
    %c0_10 = arith.constant 0 : index
    %18 = vector.load %arg3[%c0_9, %c0_10] : memref<128x128xbf16, #tpu.memory_space<vmem>>, vector<128x128xbf16>
    %19 = arith.index_cast %1 : i32 to index
    %c0_11 = arith.constant 0 : index
    %20 = vector.load %arg9[%19, %c0_11] : memref<128x128xbf16, #tpu.memory_space<vmem>>, vector<128x128xbf16>
    %cst = arith.constant dense<0.000000e+00> : vector<128x128xf32>
    %21 = tpu.matmul %18, %20, %cst {dimension_numbers = #tpu.dot_dimension_numbers<[1], [0], [0], [1], [0, 0, 1, 1], [], []>} : vector<128x128xbf16>, vector<128x128xbf16>, vector<128x128xf32> -> vector<128x128xf32>
    %22 = arith.addf %17, %21 : vector<128x128xf32>
    %c0_12 = arith.constant 0 : index
    %c0_13 = arith.constant 0 : index
    %23 = vector.load %arg7[%c0_12, %c0_13] : memref<128x128xf32, #tpu.memory_space<vmem>>, vector<128x128xf32>
    tpu.vector_store %arg7[%c0_12, %c0_13], %22 {strides = array<i32>} : memref<128x128xf32, #tpu.memory_space<vmem>>, vector<128x128xf32>,
    %c0_i32_14 = arith.constant 0 : i32
    %24 = arith.cmpi eq, %arg2, %c0_i32_14 : i32
    %c2_i32 = arith.constant 2 : i32
    %25 = arith.cmpi slt, %arg0, %c2_i32 : i32
    %26 = arith.andi %24, %25 : i1
    %27 = arith.extui %26 : i1 to i32
    %c0_i32_15 = arith.constant 0 : i32
    %28 = arith.cmpi ne, %27, %c0_i32_15 : i32
    scf.if %28 {
      %c0_19 = arith.constant 0 : index
      %c0_20 = arith.constant 0 : index
      %34 = vector.load %arg7[%c0_19, %c0_20] : memref<128x128xf32, #tpu.memory_space<vmem>>, vector<128x128xf32>
      %c0_21 = arith.constant 0 : index
      %c0_22 = arith.constant 0 : index
      %c0_23 = arith.constant 0 : index
      %35 = vector.load %arg6[%c0_21, %c0_22, %c0_23] : memref<1x1x128xf32, #tpu.memory_space<vmem>>, vector<1x1x128xf32>
      %36 = vector.shape_cast %35 : vector<1x1x128xf32> to vector<1x128xf32>
      %37 = vector.broadcast %36 : vector<1x128xf32> to vector<128x128xf32>
      %38 = arith.addf %34, %37 : vector<128x128xf32>
      %cst_24 = arith.constant 0.000000e+00 : f32
      %39 = vector.broadcast %cst_24 : f32 to vector<128x128xf32>
      %40 = arith.maximumf %38, %39 : vector<128x128xf32>
      %41 = arith.truncf %40 : vector<128x128xf32> to vector<128x128xbf16>
      %42 = arith.index_cast %3 : i32 to index
      %c0_25 = arith.constant 0 : index
      %43 = vector.load %arg8[%42, %c0_25] : memref<128x128xbf16, #tpu.memory_space<vmem>>, vector<128x128xbf16>
      tpu.vector_store %arg8[%42, %c0_25], %41 {strides = array<i32>} : memref<128x128xbf16, #tpu.memory_space<vmem>>, vector<128x128xbf16>,
    } else {
    }
    %c0_i32_16 = arith.constant 0 : i32
    %29 = arith.cmpi eq, %arg2, %c0_i32_16 : i32
    %c2_i32_17 = arith.constant 2 : i32
    %30 = arith.cmpi eq, %arg0, %c2_i32_17 : i32
    %31 = arith.andi %29, %30 : i1
    %32 = arith.extui %31 : i1 to i32
    %c0_i32_18 = arith.constant 0 : i32
    %33 = arith.cmpi ne, %32, %c0_i32_18 : i32
    scf.if %33 {
      %c0_19 = arith.constant 0 : index
      %c0_20 = arith.constant 0 : index
      %34 = vector.load %arg7[%c0_19, %c0_20] : memref<128x128xf32, #tpu.memory_space<vmem>>, vector<128x128xf32>
      %c0_21 = arith.constant 0 : index
      %c0_22 = arith.constant 0 : index
      %c0_23 = arith.constant 0 : index
      %35 = vector.load %arg6[%c0_21, %c0_22, %c0_23] : memref<1x1x128xf32, #tpu.memory_space<vmem>>, vector<1x1x128xf32>
      %36 = vector.shape_cast %35 : vector<1x1x128xf32> to vector<1x128xf32>
      %37 = vector.broadcast %36 : vector<1x128xf32> to vector<128x128xf32>
      %38 = arith.addf %34, %37 : vector<128x128xf32>
      %39 = tpu.iota {dimensions = array<i32: 1>} : vector<128x128xi32>
      %c4_i32 = arith.constant 4 : i32
      %40 = vector.broadcast %c4_i32 : i32 to vector<128x128xi32>
      %41 = arith.cmpi slt, %39, %40 : vector<128x128xi32>
      %cst_24 = arith.constant -1.000000e+30 : f32
      %42 = vector.broadcast %cst_24 : f32 to vector<128x128xf32>
      %43 = arith.select %41, %38, %42 : vector<128x128xi1>, vector<128x128xf32>
      %cst_25 = arith.constant dense<0xFF800000> : vector<128xf32>
      %44 = vector.multi_reduction <maximumf>, %43, %cst_25 [1] : vector<128x128xf32> to vector<128xf32>
      %45 = vector.shape_cast %44 : vector<128xf32> to vector<128x1xf32>
      %46 = vector.broadcast %45 : vector<128x1xf32> to vector<128x128xf32>
      %47 = arith.subf %43, %46 : vector<128x128xf32>
      %48 = math.exp %47 : vector<128x128xf32>
      %cst_26 = arith.constant dense<0.000000e+00> : vector<128xf32>
      %49 = vector.multi_reduction <add>, %48, %cst_26 [1] : vector<128x128xf32> to vector<128xf32>
      %50 = vector.shape_cast %49 : vector<128xf32> to vector<128x1xf32>
      %51 = math.log %50 : vector<128x1xf32>
      %52 = vector.broadcast %51 : vector<128x1xf32> to vector<128x128xf32>
      %53 = arith.subf %47, %52 : vector<128x128xf32>
      %c0_27 = arith.constant 0 : index
      %c0_28 = arith.constant 0 : index
      %54 = vector.load %arg7[%c0_27, %c0_28] : memref<128x128xf32, #tpu.memory_space<vmem>>, vector<128x128xf32>
      tpu.vector_store %arg7[%c0_27, %c0_28], %53 {strides = array<i32>} : memref<128x128xf32, #tpu.memory_space<vmem>>, vector<128x128xf32>,
    } else {
    }
    return
  }
  func.func @transform_0(%arg0: i32, %arg1: i32, %arg2: i32) -> (i32, i32) {
    %c0_i32 = arith.constant 0 : i32
    return %arg1, %arg2 : i32, i32
  }
  func.func @transform_2(%arg0: i32, %arg1: i32, %arg2: i32) -> (i32, i32, i32) {
    %c0_i32 = arith.constant 0 : i32
    %c0_i32_0 = arith.constant 0 : i32
    %c0_i32_1 = arith.constant 0 : i32
    return %arg0, %c0_i32, %c0_i32_0 : i32, i32, i32
  }
  func.func @transform_3(%arg0: i32, %arg1: i32, %arg2: i32) -> (i32, i32, i32) {
    %c0_i32 = arith.constant 0 : i32
    %c0_i32_0 = arith.constant 0 : i32
    %c0_i32_1 = arith.constant 0 : i32
    return %arg0, %c0_i32, %c0_i32_0 : i32, i32, i32
  }
  func.func @transform_4(%arg0: i32, %arg1: i32, %arg2: i32) -> (i32, i32) {
    %c0_i32 = arith.constant 0 : i32
    %c0_i32_0 = arith.constant 0 : i32
    return %arg1, %c0_i32 : i32, i32
  }
}

</mosaic_0001>

<bundles_post_ra>
// kernel: gcn_forward_padded.1
= control target key start
LH: loop header
LB: loop body
LE: loop exit
PB: predicated region body
PF: predicated region fallthrough
CT: control target
= control target key end

     0   :  { %9 = vsyncpa [#allocation6], 0  ;;  %s2407_s0 = inlined_call_operand.hbm [shape: bf16[128,128], index: 0, kind: input, shape index: {}]   ;;  %s2408_s1 = inlined_call_operand.hbm [shape: bf16[128,128], index: 1, kind: input, shape index: {}]   ;;  %s2409_s2 = inlined_call_operand.hbm [shape: bf16[3,128,128], index: 2, kind: input, shape index: {}]   ;;  %s2410_s3 = inlined_call_operand.vmem [shape: f32[3,1,128], index: 3, kind: input, shape index: {}]   ;;  %s2411_s4 = inlined_call_operand.vmem [shape: f32[128,128], index: 4, kind: output, shape index: {}]  }
   0x1   :  { %10 = vsyncpa [#allocation8], 0 }
   0x2   :  { %12 = vsyncpa [#allocation8 + $0x1], 0  ;;  %s1906_s15 = smov 0   ;;  %s1908_s16 = smov 0  }
   0x3   :  { %s1910_s17 = smov 0   ;;  %s1912_s18 = smov 0  }
   0x4   :  { %s1914_s19 = smov 0   ;;  %s1916_s20 = smov 0  }
   0x5 LB: > { %s1339_s21 = sadd.s32 4294967295, %s1874_s20   ;;  %p85_p0 = scmp.ne.s32.totalorder %s1858_s16, %s1854_s15  ;;  %s1874_s20 = sphi %s1916_s20, %s18_s20   ;;  %s1870_s19 = sphi %s1914_s19, %s2428_s19   ;;  %s1866_s18 = sphi %s1912_s18, %s2427_s18   ;;  %s1862_s17 = sphi %s1910_s17, %s2426_s17   ;;  %s1858_s16 = sphi %s1908_s16, %s2425_s16   ;;  %s1854_s15 = sphi %s1906_s15, %s2424_s15  }
   0x6   : > { %p1936_p1 = scmp.eq.s32.totalorder %s1339_s21, 0  ;;  %p1340_p2 = scmp.ge.s32.totalorder %s1874_s20, 1 }
   0x7   : > { %p148_p3 = scmp.lt.s32.totalorder %s1874_s20, 4  ;;  %s1876_s25 = smov [#allocation5]  }
   0x8   : > { %s2416_s22 = scalar_select %p1936_p1, 1, 0 }
   0x9   : > { %p1944_p4 = por %p1936_p1, %p85_p0  ;;  %p1948_p5 = pnand %p1340_p2, %p148_p3 }
   0xa   : > { %s164_s26 = sshll.u32 %s1876_s25, 4  ;;  %s37_s28 = sadd.s32 1, %s1870_s19  ;;  %s165_s26 = int_to_ptr.vmem [resolvable:$true] %s164_s26 }
   0xb   : > { %s2417_s23 = scalar_select %p1944_p4, 1, 0 }
   0xc   : > { %s2418_s24 = scalar_select %p1948_p5, 1, 0 }
   0xd   : > { %p1586_p6 = pneg %p1948_p5  ;;  %s1738_s5 = scalar_lea.hbm %s2407_s0, 1024 }
   0xe   : > { %p1739_p8 = scmp.ne.s32.totalorder %s2407_s0, %s1738_s5  ;;  %p1745_p12 = scmp.lt.u32.totalorder %s1738_s5, %s2407_s0 }
   0xf   : > { %p1956_p7 = pnand %p1586_p6, %p1936_p1 }
  0x11   : > { %p1740_p9 = pneg %p1956_p7 }
  0x13   : > { %p1741_p10 = pnand %p1740_p9, %p1739_p8 }
  0x15   : > { %p1742_p11 = pneg %p1741_p10 }
  0x17   : > { %p1747_p13 = pnand %p1745_p12, %p1742_p11 }
  0x19   : > { %1750 = shalt.err (!%p1747_p13)
}
  0x1a   : > { %s1751_s10 = scalar_lea.vmem %s165_s26, 1024  ;;  %p1759_p6 = scmp.lt.s32.totalorder %s165_s26, %s165_s26 }
  0x1b   : > { %p1752_p0 = scmp.ne.s32.totalorder %s165_s26, %s1751_s10  ;;  %p1760_p4 = scmp.lt.s32.totalorder %s1751_s10, %s1751_s10 }
  0x1d   : > { %p1754_p2 = pnand %p1752_p0, %p1740_p9  ;;  %p1761_p1 = por %p1760_p4, %p1759_p6 }
  0x1f   : > { %p1755_p3 = pneg %p1754_p2 }
  0x21   : > { %p1762_p5 = pnand %p1761_p1, %p1755_p3 }
  0x23   : > { %1765 = shalt.err (!%p1762_p5)
}
  0x24   : > { %s1877_s11 = smov 64   ;;  %s1878_s12 = smov 4  }
  0x25   : > { %1589 = dma.hbm_to_vmem [thread:$0]  (!%p1956_p7), %s2407_s0, 1024, %s165_s26, [#allocation6], %s1877_s11, %s1877_s11, %s1878_s12  }
  0x26   : > { %p39_p1 = scmp.ge.s32.totalorder %s37_s28, 3  ;;  %s72_s15 = sadd.s32 1, %s1862_s17 }
  0x27   : > { %p79_p4 = scmp.ne.s32.totalorder %s1862_s17, %s1858_s16  ;;  %p80_p5 = scmp.eq.s32.totalorder %s1874_s20, 0 }
  0x28   : > { %s2430_s28 = smov (%p39_p1, %s37_s28), 0  ;;  %p1595_p9 = scmp.lt.s32.totalorder %s1874_s20, 3 }
  0x29   : > { %p81_p8 = por %p80_p5, %p79_p4  ;;  %s69_s21 = ssub.s32 %s1870_s19, %s2430_s28 }
  0x2a   : > { %s178_s25 = sand.u32 1, %s1862_s17   ;;  %p70_p10 = scmp.eq.s32.totalorder %s69_s21, 0 }
  0x2b   : > { %s1343_s27 = sshll.u32 %s178_s25, 6  ;;  %s1383_s29 = sshll.u32 %s1870_s19, 10 }
  0x2c   : > { %s1992_s30 = scalar_select %p70_p10, %s1862_s17, %s72_s15  }
  0x2d   : > { %s1997_s26 = scalar_lea.hbm %s2409_s2, %s1383_s29  ;;  %s182_s7 = scalar_lea.vmem [#allocation7], %s1343_s27 }
  0x2e   : > { %s189_s8 = sshll.u32 %s182_s7, 4  ;;  %p1999_p7 = pnand %p1595_p9, %p81_p8  ;;  %s2003_s8 = int_to_ptr.vmem [resolvable:$true] %s189_s8 }
  0x2f   : > { %s2005_s10 = scalar_lea.sflag [#allocation8], %s178_s25  ;;  %s1766_s13 = scalar_lea.hbm %s1997_s26, 1024 }
  0x30   : > { %p1767_p11 = scmp.ne.s32.totalorder %s1997_s26, %s1766_s13  ;;  %p1768_p12 = pneg %p1999_p7 }
  0x31   : > { %s1771_s21 = scalar_lea.hbm %s2409_s2, 3072  ;;  %p1772_p2 = scmp.lt.u32.totalorder %s1997_s26, %s2409_s2 }
  0x32   : > { %p1769_p13 = pnand %p1768_p12, %p1767_p11  ;;  %p1773_p3 = scmp.lt.u32.totalorder %s1771_s21, %s1766_s13 }
  0x33   : > { %p1775_p1 = scmp.lt.u32.totalorder %s1766_s13, %s1997_s26 }
  0x34   : > { %p1770_p0 = pneg %p1769_p13  ;;  %p1774_p6 = por %p1773_p3, %p1772_p2 }
  0x36   : > { %p1776_p4 = por %p1775_p1, %p1774_p6 }
  0x38   : > { %p1777_p5 = pnand %p1776_p4, %p1770_p0 }
  0x3a   : > { %1780 = shalt.err (!%p1777_p5)
}
  0x3b   : > { %s1781_s25 = scalar_lea.vmem %s2003_s8, 1024  ;;  %s1879_s5 = smov [#allocation7]  }
  0x3c   : > { %p1782_p8 = scmp.ne.s32.totalorder %s2003_s8, %s1781_s25  ;;  %s1786_s6 = sshll.u32 %s1879_s5, 4  ;;  %s1787_s6 = int_to_ptr.vmem [resolvable:$false] %s1786_s6 }
  0x3d   : > { %s1788_s7 = scalar_lea.vmem %s1787_s6, 2048  ;;  %p1789_p11 = scmp.lt.s32.totalorder %s2003_s8, %s1787_s6 }
  0x3e   : > { %p1784_p9 = pnand %p1782_p8, %p1768_p12  ;;  %p1790_p13 = scmp.lt.s32.totalorder %s1788_s7, %s1781_s25 }
  0x40   : > { %p1785_p10 = pneg %p1784_p9  ;;  %p1791_p2 = por %p1790_p13, %p1789_p11 }
  0x42   : > { %p1792_p3 = pnand %p1791_p2, %p1785_p10 }
  0x44   : > { %1795 = shalt.err (!%p1792_p3)
}
  0x45   : > { %1593 = dma.hbm_to_vmem [thread:$0]  (!%p1999_p7), %s1997_s26, 1024, %s2003_s8, %s2005_s10, %s1877_s11, %s1877_s11, %s1878_s12  }
  0x46   : > { %p2421_p12 = scmp.ne.s32.totalorder %s2418_s24, 0 }
  0x47   : > { %p2422_p0 = scmp.ne.s32.totalorder (!%p2421_p12), %s2416_s22, 0 }
  0x48   : > { %207 = sbr.rel (%p2421_p12) target bundleno = 1256 (0x4e8), region = 32 }
  0x4f   : > { %1843 = dma.done.wait (%p2422_p0), [#allocation6], 1024  }
  0x50   : > { %1845 = vsyncadd (%p2422_p0), [#allocation6], 4294966272  ;;  %s213_s13 = sand.u32 1, %s1858_s16   ;;  %p2423_p6 = scmp.ne.s32.totalorder %s2417_s23, 0 }
  0x51   : > { %s1348_s9 = sshll.u32 %s213_s13, 6  ;;  %s214_s14 = scalar_lea.sflag [#allocation8], %s213_s13 }
  0x52   : > { %s2043_s15 = scalar_lea.vmem [#allocation7], %s1348_s9 }
  0x53   : > { %1847 = dma.done.wait (%p2423_p6), %s214_s14, 1024  }
  0x54   : > { %1849 = vsyncadd (%p2423_p6), %s214_s14, 4294966272  ;;  %p244_p7 = scmp.lt.s32.totalorder %s1866_s18, 2  ;;  %p257_p1 = scmp.eq.s32.totalorder %s1866_s18, 0 }
  0x56   : > { %s245_s22 = scalar_select %p244_p7, %s1866_s18, 2 }
  0x57   : > { %261 = sbr.rel (!%p257_p1) target bundleno = 370 (0x172), region = 44 }
  0x58   : > { %s2057_s12 = scalar_lea.vmem %s2410_s3, %s245_s22 }
  0x5e   : > { %s1880_s26 = smov [#allocation4]   ;;  %s1796_s21 = scalar_lea.hbm %s2408_s1, 1024 }
  0x5f   : > { %s273_s8 = sshll.u32 %s1880_s26, 4  ;;  %p1797_p4 = scmp.ne.s32.totalorder %s2408_s1, %s1796_s21  ;;  %s274_s8 = int_to_ptr.vmem [resolvable:$true] %s273_s8 }
  0x60   : > { %p1800_p5 = scmp.lt.u32.totalorder %s1796_s21, %s2408_s1 }
  0x62   : > { %p1802_p8 = pnand %p1800_p5, %p1797_p4 }
  0x64   : > { %1805 = shalt.err (!%p1802_p8)  }
  0x65   : > { %s1806_s6 = scalar_lea.vmem %s274_s8, 1024  ;;  %p1811_p10 = scmp.lt.s32.totalorder %s274_s8, %s274_s8 }
  0x66   : > { %p1807_p9 = scmp.ne.s32.totalorder %s274_s8, %s1806_s6  ;;  %p1812_p11 = scmp.lt.s32.totalorder %s1806_s6, %s1806_s6 }
  0x68   : > { %p1813_p13 = por %p1812_p11, %p1811_p10 }
  0x6a   : > { %p1814_p2 = pnand %p1813_p13, %p1807_p9 }
  0x6c   : > { %1817 = shalt.err (!%p1814_p2)  }
  0x6d   : > { %276 = dma.hbm_to_vmem [thread:$0]  %s2408_s1, 1024, %s274_s8, [#allocation9] }
  0x6e   : > { %1850 = dma.done.wait [#allocation9], 1024 }
  0x6f   : > { %1851 = vsyncadd [#allocation9], 4294966272  ;;  %v1650_v0 = vld [vmem:[%s2043_s15] sm:$0xff]   ;;  %v1651_v1 = vld [vmem:[%s2043_s15 + $0x8] sm:$0xff]  }
  0x70   : > { %1436 = vmatprep.subr.bf16.mxu0 %v1650_v0  ;;  %1532 = vmatprep.subr.bf16.mxu1 %v1650_v0  ;;  %v1652_v2 = vld [vmem:[%s2043_s15 + $0x10] sm:$0xff]   ;;  %v1653_v3 = vld [vmem:[%s2043_s15 + $0x18] sm:$0xff]   ;;  %v281_v4 = vld [vmem:[#allocation4] sm:$0xff] }
  0x71   : > { %1437 = vmatpush3.bf16.msra.mxu0 %v1650_v0  ;;  %1540 = vmatpush3.bf16.msra.mxu1 %v1650_v0  ;;  %v285_v5 = vld [vmem:[#allocation4 + $0x20] sm:$0xff]  ;;  %v1655_v7 = vld [vmem:[%s2043_s15 + $0x28] sm:$0xff]   ;;  %v1656_v8 = vld [vmem:[%s2043_s15 + $0x30] sm:$0xff]  }
  0x72   : > { %1438 = vmatprep.subr.bf16.mxu0 %v1651_v1  ;;  %1533 = vmatprep.subr.bf16.mxu1 %v1651_v1  ;;  %v1654_v6 = vld [vmem:[%s2043_s15 + $0x20] sm:$0xff]   ;;  %v1657_v9 = vld [vmem:[%s2043_s15 + $0x38] sm:$0xff]   ;;  %v282_v10 = vld [vmem:[#allocation4 + $0x8] sm:$0xff] }
  0x73   : > { %1452 = vmatprep.mubr.bf16.mxu0 %v281_v4  ;;  %1460 = vmatprep.mubr.bf16.mxu1 %v285_v5  ;;  %v286_v11 = vld [vmem:[#allocation4 + $0x28] sm:$0xff]  ;;  %v283_v12 = vld [vmem:[#allocation4 + $0x10] sm:$0xff]  ;;  %v284_v14 = vld [vmem:[#allocation4 + $0x18] sm:$0xff] }
  0x74   : > { %v287_v13 = vld [vmem:[#allocation4 + $0x30] sm:$0xff]  ;;  %v288_v15 = vld [vmem:[#allocation4 + $0x38] sm:$0xff] }
  0x75   : > { %1439 = vmatpush3.bf16.msra.mxu0 %v1651_v1  ;;  %1541 = vmatpush3.bf16.msra.mxu1 %v1651_v1 }
  0x76   : > { %1440 = vmatprep.subr.bf16.mxu0 %v1652_v2  ;;  %1534 = vmatprep.subr.bf16.mxu1 %v1652_v2 }
  0x79   : > { %1441 = vmatpush3.bf16.msra.mxu0 %v1652_v2  ;;  %1542 = vmatpush3.bf16.msra.mxu1 %v1652_v2 }
  0x7a   : > { %1442 = vmatprep.subr.bf16.mxu0 %v1653_v3  ;;  %1535 = vmatprep.subr.bf16.mxu1 %v1653_v3 }
  0x7d   : > { %1443 = vmatpush3.bf16.msra.mxu0 %v1653_v3  ;;  %1543 = vmatpush3.bf16.msra.mxu1 %v1653_v3 }
  0x7e   : > { %1444 = vmatprep.subr.bf16.mxu0 %v1654_v6  ;;  %1536 = vmatprep.subr.bf16.mxu1 %v1654_v6 }
  0x81   : > { %1445 = vmatpush3.bf16.msra.mxu0 %v1654_v6  ;;  %1544 = vmatpush3.bf16.msra.mxu1 %v1654_v6 }
  0x82   : > { %1446 = vmatprep.subr.bf16.mxu0 %v1655_v7  ;;  %1537 = vmatprep.subr.bf16.mxu1 %v1655_v7 }
  0x85   : > { %1447 = vmatpush3.bf16.msra.mxu0 %v1655_v7  ;;  %1545 = vmatpush3.bf16.msra.mxu1 %v1655_v7 }
  0x86   : > { %1448 = vmatprep.subr.bf16.mxu0 %v1656_v8  ;;  %1538 = vmatprep.subr.bf16.mxu1 %v1656_v8 }
  0x89   : > { %1449 = vmatpush3.bf16.msra.mxu0 %v1656_v8  ;;  %1546 = vmatpush3.bf16.msra.mxu1 %v1656_v8 }
  0x8a   : > { %1450 = vmatprep.subr.bf16.mxu0 %v1657_v9  ;;  %1539 = vmatprep.subr.bf16.mxu1 %v1657_v9 }
  0x8d   : > { %1451 = vmatpush3.bf16.msra.mxu0 %v1657_v9  ;;  %1547 = vmatpush3.bf16.msra.mxu1 %v1657_v9 }
  0x90   : > { %1453 = vmatmul.mubr.bf16.vlgmr.msra.gmra.mrb[0].mxu0 %v282_v10  ;;  %1461 = vmatmul.mubr.bf16.vlgmr.msra.gmra.mrb[0].mxu1 %v286_v11 }
  0x91   : > { %1456 = vmatprep.mubr.bf16.mxu0 %v283_v12  ;;  %1464 = vmatprep.mubr.bf16.mxu1 %v287_v13 }
  0x98   : > { %1457 = vmatmul.mubr.bf16.gmra.mrb[4].mxu0 %v284_v14  ;;  %1465 = vmatmul.mubr.bf16.gmra.mrb[4].mxu1 %v288_v15 }
 0x163   : > { %v1454_v16 = vpop.f32.mrb[0].mxu0  ;;  %v1462_v17 = vpop.f32.mrb[0].mxu1 }
 0x164   : > { %v387_v18 = vpop.f32.mrb[1].mxu0  ;;  %v419_v19 = vpop.f32.mrb[1].mxu1 }
 0x165   : > { %v1455_v20 = vpop.f32.mrb[2].mxu0  ;;  %v1463_v21 = vpop.f32.mrb[2].mxu1 }
 0x166   : > { %v451_v22 = vpack.c.bf16 %v1455_v20, %v1454_v16  ;;  %v455_v23 = vpack.c.bf16 %v1463_v21, %v1462_v17  ;;  %v390_v24 = vpop.f32.mrb[3].mxu0  ;;  %v422_v25 = vpop.f32.mrb[3].mxu1 }
 0x167   : > { %v450_v26 = vpack.c.bf16 %v390_v24, %v387_v18  ;;  %v454_v27 = vpack.c.bf16 %v422_v25, %v419_v19 }
 0x168   : > { %463 = vst [vmem:[#allocation3 + $0x8] sm:$0xff] %v451_v22  ;;  %467 = vst [vmem:[#allocation3 + $0x28] sm:$0xff] %v455_v23 }
 0x169   : > { %462 = vst [vmem:[#allocation3] sm:$0xff] %v450_v26  ;;  %466 = vst [vmem:[#allocation3 + $0x20] sm:$0xff] %v454_v27 }
 0x16b   : > { %v1458_v28 = vpop.f32.mrb[4].mxu0  ;;  %v1466_v29 = vpop.f32.mrb[4].mxu1 }
 0x16c   : > { %v403_v30 = vpop.f32.mrb[5].mxu0  ;;  %v435_v31 = vpop.f32.mrb[5].mxu1 }
 0x16d   : > { %v1459_v32 = vpop.f32.mrb[6].mxu0  ;;  %v1467_v33 = vpop.f32.mrb[6].mxu1 }
 0x16e   : > { %v453_v34 = vpack.c.bf16 %v1459_v32, %v1458_v28  ;;  %v457_v35 = vpack.c.bf16 %v1467_v33, %v1466_v29  ;;  %v406_v36 = vpop.f32.mrb[7].mxu0  ;;  %v438_v37 = vpop.f32.mrb[7].mxu1 }
 0x16f   : > { %v452_v38 = vpack.c.bf16 %v406_v36, %v403_v30  ;;  %v456_v39 = vpack.c.bf16 %v438_v37, %v435_v31 }
 0x170   : > { %465 = vst [vmem:[#allocation3 + $0x18] sm:$0xff] %v453_v34  ;;  %469 = vst [vmem:[#allocation3 + $0x38] sm:$0xff] %v457_v35 }
 0x171   : > { %464 = vst [vmem:[#allocation3 + $0x10] sm:$0xff] %v452_v38  ;;  %468 = vst [vmem:[#allocation3 + $0x30] sm:$0xff] %v456_v39 }
 0x172 PF: > { %p470_p3 = scmp.gt.s32.totalorder %s1866_s18, 0 }
 0x173   : > { %v1658_v40 = vld [vmem:[%s2043_s15] sm:$0xff] (%p470_p3)   ;;  %v1659_v41 = vld [vmem:[%s2043_s15 + $0x8] sm:$0xff] (%p470_p3)   ;;  %v1660_v42 = vld [vmem:[%s2043_s15 + $0x10] sm:$0xff] (%p470_p3)  }
 0x174   : > { %474 = sbr.rel (!%p470_p3) target bundleno = 630 (0x276), region = 53  ;;  %1468 = vmatprep.subr.bf16.mxu0 (%p470_p3), %v1658_v40  ;;  %1548 = vmatprep.subr.bf16.mxu1 (%p470_p3), %v1658_v40  ;;  %v1661_v43 = vld [vmem:[%s2043_s15 + $0x18] sm:$0xff] (%p470_p3)   ;;  %v479_v44 = vld [vmem:[#allocation2] sm:$0xff] (%p470_p3)  ;;  %v1663_v47 = vld [vmem:[%s2043_s15 + $0x28] sm:$0xff] (%p470_p3)  }
 0x175   : > { %1469 = vmatpush3.bf16.msra.mxu0 (%p470_p3), %v1658_v40  ;;  %1556 = vmatpush3.bf16.msra.mxu1 (%p470_p3), %v1658_v40  ;;  %v483_v45 = vld [vmem:[#allocation2 + $0x20] sm:$0xff] (%p470_p3)  ;;  %v1664_v48 = vld [vmem:[%s2043_s15 + $0x30] sm:$0xff] (%p470_p3)   ;;  %v1665_v49 = vld [vmem:[%s2043_s15 + $0x38] sm:$0xff] (%p470_p3)  }
 0x176   : > { %1470 = vmatprep.subr.bf16.mxu0 (%p470_p3), %v1659_v41  ;;  %1549 = vmatprep.subr.bf16.mxu1 (%p470_p3), %v1659_v41  ;;  %v1662_v46 = vld [vmem:[%s2043_s15 + $0x20] sm:$0xff] (%p470_p3)   ;;  %v480_v50 = vld [vmem:[#allocation2 + $0x8] sm:$0xff] (%p470_p3)  ;;  %v481_v52 = vld [vmem:[#allocation2 + $0x10] sm:$0xff] (%p470_p3) }
 0x177   : > { %1484 = vmatprep.mubr.bf16.mxu0 (%p470_p3), %v479_v44  ;;  %1492 = vmatprep.mubr.bf16.mxu1 (%p470_p3), %v483_v45  ;;  %v484_v51 = vld [vmem:[#allocation2 + $0x28] sm:$0xff] (%p470_p3)  ;;  %v485_v53 = vld [vmem:[#allocation2 + $0x30] sm:$0xff] (%p470_p3)  ;;  %v482_v54 = vld [vmem:[#allocation2 + $0x18] sm:$0xff] (%p470_p3) }
 0x178   : > { %v486_v55 = vld [vmem:[#allocation2 + $0x38] sm:$0xff] (%p470_p3) }
 0x179   : > { %1471 = vmatpush3.bf16.msra.mxu0 (%p470_p3), %v1659_v41  ;;  %1557 = vmatpush3.bf16.msra.mxu1 (%p470_p3), %v1659_v41 }
 0x17a   : > { %1472 = vmatprep.subr.bf16.mxu0 (%p470_p3), %v1660_v42  ;;  %1550 = vmatprep.subr.bf16.mxu1 (%p470_p3), %v1660_v42 }
 0x17d   : > { %1473 = vmatpush3.bf16.msra.mxu0 %v1660_v42  ;;  %1558 = vmatpush3.bf16.msra.mxu1 %v1660_v42 }
 0x17e   : > { %1474 = vmatprep.subr.bf16.mxu0 %v1661_v43  ;;  %1551 = vmatprep.subr.bf16.mxu1 %v1661_v43 }
 0x181   : > { %1475 = vmatpush3.bf16.msra.mxu0 %v1661_v43  ;;  %1559 = vmatpush3.bf16.msra.mxu1 %v1661_v43 }
 0x182   : > { %1476 = vmatprep.subr.bf16.mxu0 %v1662_v46  ;;  %1552 = vmatprep.subr.bf16.mxu1 %v1662_v46 }
 0x185   : > { %1477 = vmatpush3.bf16.msra.mxu0 %v1662_v46  ;;  %1560 = vmatpush3.bf16.msra.mxu1 %v1662_v46 }
 0x186   : > { %1478 = vmatprep.subr.bf16.mxu0 %v1663_v47  ;;  %1553 = vmatprep.subr.bf16.mxu1 %v1663_v47 }
 0x189   : > { %1479 = vmatpush3.bf16.msra.mxu0 %v1663_v47  ;;  %1561 = vmatpush3.bf16.msra.mxu1 %v1663_v47 }
 0x18a   : > { %1480 = vmatprep.subr.bf16.mxu0 %v1664_v48  ;;  %1554 = vmatprep.subr.bf16.mxu1 %v1664_v48 }
 0x18d   : > { %1481 = vmatpush3.bf16.msra.mxu0 %v1664_v48  ;;  %1562 = vmatpush3.bf16.msra.mxu1 %v1664_v48 }
 0x18e   : > { %1482 = vmatprep.subr.bf16.mxu0 %v1665_v49  ;;  %1555 = vmatprep.subr.bf16.mxu1 %v1665_v49 }
 0x191   : > { %1483 = vmatpush3.bf16.msra.mxu0 %v1665_v49  ;;  %1563 = vmatpush3.bf16.msra.mxu1 %v1665_v49 }
 0x194   : > { %1485 = vmatmul.mubr.bf16.vlgmr.msra.gmra.mrb[0].mxu0 %v480_v50  ;;  %1493 = vmatmul.mubr.bf16.vlgmr.msra.gmra.mrb[0].mxu1 %v484_v51 }
 0x195   : > { %1488 = vmatprep.mubr.bf16.mxu0 %v481_v52  ;;  %1496 = vmatprep.mubr.bf16.mxu1 %v485_v53 }
 0x19c   : > { %1489 = vmatmul.mubr.bf16.gmra.mrb[4].mxu0 %v482_v54  ;;  %1497 = vmatmul.mubr.bf16.gmra.mrb[4].mxu1 %v486_v55 }
 0x267   : > { %v1486_v56 = vpop.f32.mrb[0].mxu0  ;;  %v1494_v57 = vpop.f32.mrb[0].mxu1 }
 0x268   : > { %v585_v58 = vpop.f32.mrb[1].mxu0  ;;  %v617_v59 = vpop.f32.mrb[1].mxu1 }
 0x269   : > { %v1487_v60 = vpop.f32.mrb[2].mxu0  ;;  %v1495_v61 = vpop.f32.mrb[2].mxu1 }
 0x26a   : > { %v649_v62 = vpack.c.bf16 %v1487_v60, %v1486_v56  ;;  %v653_v63 = vpack.c.bf16 %v1495_v61, %v1494_v57  ;;  %v588_v0 = vpop.f32.mrb[3].mxu0  ;;  %v620_v1 = vpop.f32.mrb[3].mxu1 }
 0x26b   : > { %v648_v2 = vpack.c.bf16 %v588_v0, %v585_v58  ;;  %v652_v3 = vpack.c.bf16 %v620_v1, %v617_v59 }
 0x26c   : > { %659 = vst [vmem:[#allocation3 + $0x8] sm:$0xff] %v649_v62  ;;  %663 = vst [vmem:[#allocation3 + $0x28] sm:$0xff] %v653_v63 }
 0x26d   : > { %658 = vst [vmem:[#allocation3] sm:$0xff] %v648_v2  ;;  %662 = vst [vmem:[#allocation3 + $0x20] sm:$0xff] %v652_v3 }
 0x26f   : > { %v1490_v4 = vpop.f32.mrb[4].mxu0  ;;  %v1498_v5 = vpop.f32.mrb[4].mxu1 }
 0x270   : > { %v601_v6 = vpop.f32.mrb[5].mxu0  ;;  %v633_v7 = vpop.f32.mrb[5].mxu1 }
 0x271   : > { %v1491_v8 = vpop.f32.mrb[6].mxu0  ;;  %v1499_v9 = vpop.f32.mrb[6].mxu1 }
 0x272   : > { %v651_v10 = vpack.c.bf16 %v1491_v8, %v1490_v4  ;;  %v655_v11 = vpack.c.bf16 %v1499_v9, %v1498_v5  ;;  %v604_v12 = vpop.f32.mrb[7].mxu0  ;;  %v636_v13 = vpop.f32.mrb[7].mxu1 }
 0x273   : > { %v650_v14 = vpack.c.bf16 %v604_v12, %v601_v6  ;;  %v654_v15 = vpack.c.bf16 %v636_v13, %v633_v7 }
 0x274   : > { %661 = vst [vmem:[#allocation3 + $0x18] sm:$0xff] %v651_v10  ;;  %665 = vst [vmem:[#allocation3 + $0x38] sm:$0xff] %v655_v11 }
 0x275   : > { %660 = vst [vmem:[#allocation3 + $0x10] sm:$0xff] %v650_v14  ;;  %664 = vst [vmem:[#allocation3 + $0x30] sm:$0xff] %v654_v15 }
 0x276 PF: > { %v722_v16 = vld [vmem:[#allocation3] sm:$0xff]  ;;  %v723_v17 = vld [vmem:[#allocation3 + $0x8] sm:$0xff]  ;;  %v1670_v28 = vld [vmem:[#allocation5 + $0x10] sm:$0xff]  }
 0x277   : > { %1500 = vmatprep.subr.bf16.mxu0 %v722_v16  ;;  %1564 = vmatprep.subr.bf16.mxu1 %v722_v16  ;;  %v1666_v19 = vld [vmem:[#allocation5] sm:$0xff]   ;;  %v727_v23 = vld [vmem:[#allocation3 + $0x28] sm:$0xff]  ;;  %v1671_v29 = vld [vmem:[#allocation5 + $0x30] sm:$0xff]  }
 0x278   : > { %1501 = vmatpush3.bf16.msra.mxu0 %v722_v16  ;;  %1572 = vmatpush3.bf16.msra.mxu1 %v722_v16  ;;  %v1667_v20 = vld [vmem:[#allocation5 + $0x20] sm:$0xff]   ;;  %v1668_v26 = vld [vmem:[#allocation5 + $0x8] sm:$0xff]   ;;  %v1672_v30 = vld [vmem:[#allocation5 + $0x18] sm:$0xff]  }
 0x279   : > { %1502 = vmatprep.subr.bf16.mxu0 %v723_v17  ;;  %1565 = vmatprep.subr.bf16.mxu1 %v723_v17  ;;  %v726_v22 = vld [vmem:[#allocation3 + $0x20] sm:$0xff]  ;;  %v1669_v27 = vld [vmem:[#allocation5 + $0x28] sm:$0xff]   ;;  %v1673_v31 = vld [vmem:[#allocation5 + $0x38] sm:$0xff]  }
 0x27a   : > { %1516 = vmatprep.mubr.bf16.mxu0 %v1666_v19  ;;  %1524 = vmatprep.mubr.bf16.mxu1 %v1667_v20  ;;  %v1376_v50 = vld [vmem:[%s2057_s12] ss:$0 sm:$0xff] (%p244_p7) }
 0x27b   : > { %v725_v21 = vld [vmem:[#allocation3 + $0x18] sm:$0xff] }
 0x27c   : > { %v724_v18 = vld [vmem:[#allocation3 + $0x10] sm:$0xff]  ;;  %1503 = vmatpush3.bf16.msra.mxu0 %v723_v17  ;;  %1573 = vmatpush3.bf16.msra.mxu1 %v723_v17  ;;  %v729_v25 = vld [vmem:[#allocation3 + $0x38] sm:$0xff] }
 0x27d   : > { %1504 = vmatprep.subr.bf16.mxu0 %v724_v18  ;;  %1566 = vmatprep.subr.bf16.mxu1 %v724_v18  ;;  %v728_v24 = vld [vmem:[#allocation3 + $0x30] sm:$0xff] }
 0x280   : > { %1505 = vmatpush3.bf16.msra.mxu0 %v724_v18  ;;  %1574 = vmatpush3.bf16.msra.mxu1 %v724_v18 }
 0x281   : > { %1506 = vmatprep.subr.bf16.mxu0 %v725_v21  ;;  %1567 = vmatprep.subr.bf16.mxu1 %v725_v21 }
 0x284   : > { %1507 = vmatpush3.bf16.msra.mxu0 %v725_v21  ;;  %1575 = vmatpush3.bf16.msra.mxu1 %v725_v21 }
 0x285   : > { %1508 = vmatprep.subr.bf16.mxu0 %v726_v22  ;;  %1568 = vmatprep.subr.bf16.mxu1 %v726_v22 }
 0x288   : > { %1509 = vmatpush3.bf16.msra.mxu0 %v726_v22  ;;  %1576 = vmatpush3.bf16.msra.mxu1 %v726_v22 }
 0x289   : > { %1510 = vmatprep.subr.bf16.mxu0 %v727_v23  ;;  %1569 = vmatprep.subr.bf16.mxu1 %v727_v23 }
 0x28c   : > { %1511 = vmatpush3.bf16.msra.mxu0 %v727_v23  ;;  %1577 = vmatpush3.bf16.msra.mxu1 %v727_v23 }
 0x28d   : > { %1512 = vmatprep.subr.bf16.mxu0 %v728_v24  ;;  %1570 = vmatprep.subr.bf16.mxu1 %v728_v24 }
 0x290   : > { %1513 = vmatpush3.bf16.msra.mxu0 %v728_v24  ;;  %1578 = vmatpush3.bf16.msra.mxu1 %v728_v24 }
 0x291   : > { %1514 = vmatprep.subr.bf16.mxu0 %v729_v25  ;;  %1571 = vmatprep.subr.bf16.mxu1 %v729_v25 }
 0x294   : > { %1515 = vmatpush3.bf16.msra.mxu0 %v729_v25  ;;  %1579 = vmatpush3.bf16.msra.mxu1 %v729_v25 }
 0x297   : > { %1517 = vmatmul.mubr.bf16.vlgmr.msra.gmra.mrb[0].mxu0 %v1668_v26  ;;  %1525 = vmatmul.mubr.bf16.vlgmr.msra.gmra.mrb[0].mxu1 %v1669_v27 }
 0x298   : > { %1520 = vmatprep.mubr.bf16.mxu0 %v1670_v28  ;;  %1528 = vmatprep.mubr.bf16.mxu1 %v1671_v29 }
 0x29f   : > { %1521 = vmatmul.mubr.bf16.gmra.mrb[4].mxu0 %v1672_v30  ;;  %1529 = vmatmul.mubr.bf16.gmra.mrb[4].mxu1 %v1673_v31 }
 0x36a   : > { %v1518_v32 = vpop.f32.mrb[0].mxu0  ;;  %v1526_v33 = vpop.f32.mrb[0].mxu1 }
 0x36b   : > { %v812_v34 = vpop.f32.mrb[1].mxu0  ;;  %v844_v35 = vpop.f32.mrb[1].mxu1  ;;  %893 = vst [vmem:[%s2411_s4 + $0x10] sm:$0xff] %v1518_v32  ;;  %901 = vst [vmem:[%s2411_s4 + $0x50] sm:$0xff] %v1526_v33 }
 0x36c   : > { %v1519_v36 = vpop.f32.mrb[2].mxu0  ;;  %v1527_v37 = vpop.f32.mrb[2].mxu1  ;;  %891 = vst [vmem:[%s2411_s4] sm:$0xff] %v812_v34  ;;  %899 = vst [vmem:[%s2411_s4 + $0x40] sm:$0xff] %v844_v35 }
 0x36d   : > { %v815_v38 = vpop.f32.mrb[3].mxu0  ;;  %v847_v39 = vpop.f32.mrb[3].mxu1  ;;  %894 = vst [vmem:[%s2411_s4 + $0x18] sm:$0xff] %v1519_v36  ;;  %902 = vst [vmem:[%s2411_s4 + $0x58] sm:$0xff] %v1527_v37 }
 0x36e   : > { %892 = vst [vmem:[%s2411_s4 + $0x8] sm:$0xff] %v815_v38  ;;  %900 = vst [vmem:[%s2411_s4 + $0x48] sm:$0xff] %v847_v39 }
 0x370   : > { %911 = sbr.rel (!%p244_p7) target bundleno = 902 (0x386), region = 61 }
 0x372   : > { %v1522_v40 = vpop.f32.mrb[4].mxu0  ;;  %v1530_v41 = vpop.f32.mrb[4].mxu1  ;;  %v914_v53 = vld [vmem:[%s2411_s4 + $0x10] sm:$0xff] (%p244_p7) }
 0x373   : > { %v828_v42 = vpop.f32.mrb[5].mxu0  ;;  %v860_v43 = vpop.f32.mrb[5].mxu1  ;;  %897 = vst [vmem:[%s2411_s4 + $0x30] sm:$0xff] %v1522_v40  ;;  %905 = vst [vmem:[%s2411_s4 + $0x70] sm:$0xff] %v1530_v41  ;;  %v912_v48 = vld [vmem:[%s2411_s4] sm:$0xff] (%p244_p7)  ;;  %v937_v56 = vadd.f32 (%p244_p7), %v1376_v50, %v914_v53  ;;  %v922_v4 = vld [vmem:[%s2411_s4 + $0x50] sm:$0xff] (%p244_p7) }
 0x374   : > { %v1523_v44 = vpop.f32.mrb[6].mxu0  ;;  %v1531_v45 = vpop.f32.mrb[6].mxu1  ;;  %895 = vst [vmem:[%s2411_s4 + $0x20] sm:$0xff] %v828_v42  ;;  %903 = vst [vmem:[%s2411_s4 + $0x60] sm:$0xff] %v860_v43  ;;  %v935_v51 = vadd.f32 (%p244_p7), %v1376_v50, %v912_v48  ;;  %v915_v54 = vld [vmem:[%s2411_s4 + $0x18] sm:$0xff] (%p244_p7)  ;;  %v920_v2 = vld [vmem:[%s2411_s4 + $0x40] sm:$0xff] (%p244_p7)  ;;  %v945_v19 = vadd.f32 (%p244_p7), %v1376_v50, %v922_v4 }
 0x375   : > { %v831_v46 = vpop.f32.mrb[7].mxu0  ;;  %v863_v47 = vpop.f32.mrb[7].mxu1  ;;  %898 = vst [vmem:[%s2411_s4 + $0x38] sm:$0xff] %v1523_v44  ;;  %906 = vst [vmem:[%s2411_s4 + $0x78] sm:$0xff] %v1531_v45  ;;  %v913_v49 = vld [vmem:[%s2411_s4 + $0x8] sm:$0xff] (%p244_p7)  ;;  %v938_v57 = vadd.f32 (%p244_p7), %v1376_v50, %v915_v54  ;;  %v953_v5 = vmax.f32 (%p244_p7), %v937_v56, 0.0  ;;  %v943_v14 = vadd.f32 (%p244_p7), %v1376_v50, %v920_v2 }
 0x376   : > { %896 = vst [vmem:[%s2411_s4 + $0x28] sm:$0xff] %v831_v46  ;;  %904 = vst [vmem:[%s2411_s4 + $0x68] sm:$0xff] %v863_v47  ;;  %v936_v52 = vadd.f32 (%p244_p7), %v1376_v50, %v913_v49  ;;  %v951_v62 = vmax.f32 (%p244_p7), %v935_v51, 0.0  ;;  %v921_v3 = vld [vmem:[%s2411_s4 + $0x48] sm:$0xff] (%p244_p7)  ;;  %v923_v9 = vld [vmem:[%s2411_s4 + $0x58] sm:$0xff] (%p244_p7)  ;;  %v961_v28 = vmax.f32 (%p244_p7), %v945_v19, 0.0 }
 0x377   : > { %v954_v6 = vmax.f32 %v938_v57, 0.0  ;;  %v944_v18 = vadd.f32 %v1376_v50, %v921_v3  ;;  %v959_v23 = vmax.f32 %v943_v14, 0.0  ;;  %v946_v24 = vadd.f32 %v1376_v50, %v923_v9 }
 0x378   : > { %v952_v63 = vmax.f32 %v936_v52, 0.0 }
 0x379   : > { %v968_v16 = vpack.c.bf16 %v954_v6, %v953_v5  ;;  %v960_v27 = vmax.f32 %v944_v18, 0.0  ;;  %v962_v30 = vmax.f32 %v946_v24, 0.0 }
 0x37a   : > { %v918_v60 = vld [vmem:[%s2411_s4 + $0x30] sm:$0xff]  ;;  %v967_v11 = vpack.c.bf16 %v952_v63, %v951_v62 }
 0x37b   : > { %v916_v55 = vld [vmem:[%s2411_s4 + $0x20] sm:$0xff]  ;;  %v941_v1 = vadd.f32 %v1376_v50, %v918_v60  ;;  %v926_v20 = vld [vmem:[%s2411_s4 + $0x70] sm:$0xff]  ;;  %980 = vst [vmem:[#allocation2 + $0x8] sm:$0xff] %v968_v16  ;;  %v971_v34 = vpack.c.bf16 %v960_v27, %v959_v23  ;;  %v972_v36 = vpack.c.bf16 %v962_v30, %v961_v28 }
 0x37c   : > { %v939_v59 = vadd.f32 %v1376_v50, %v916_v55  ;;  %v919_v61 = vld [vmem:[%s2411_s4 + $0x38] sm:$0xff]  ;;  %v924_v10 = vld [vmem:[%s2411_s4 + $0x60] sm:$0xff]  ;;  %979 = vst [vmem:[#allocation2] sm:$0xff] %v967_v11  ;;  %v949_v32 = vadd.f32 %v1376_v50, %v926_v20 }
 0x37d   : > { %v917_v58 = vld [vmem:[%s2411_s4 + $0x28] sm:$0xff]  ;;  %v942_v8 = vadd.f32 %v1376_v50, %v919_v61  ;;  %v957_v13 = vmax.f32 %v941_v1, 0.0  ;;  %v927_v21 = vld [vmem:[%s2411_s4 + $0x78] sm:$0xff]  ;;  %v947_v25 = vadd.f32 %v1376_v50, %v924_v10  ;;  %983 = vst [vmem:[#allocation2 + $0x20] sm:$0xff] %v971_v34  ;;  %984 = vst [vmem:[#allocation2 + $0x28] sm:$0xff] %v972_v36 }
 0x37e   : > { %v940_v0 = vadd.f32 %v1376_v50, %v917_v58  ;;  %v955_v7 = vmax.f32 %v939_v59, 0.0  ;;  %v925_v15 = vld [vmem:[%s2411_s4 + $0x68] sm:$0xff]  ;;  %v950_v33 = vadd.f32 %v1376_v50, %v927_v21  ;;  %v965_v37 = vmax.f32 %v949_v32, 0.0 }
 0x37f   : > { %v958_v17 = vmax.f32 %v942_v8, 0.0  ;;  %v948_v29 = vadd.f32 %v1376_v50, %v925_v15  ;;  %v963_v31 = vmax.f32 %v947_v25, 0.0 }
 0x380   : > { %v956_v12 = vmax.f32 %v940_v0, 0.0  ;;  %v966_v38 = vmax.f32 %v950_v33, 0.0 }
 0x381   : > { %v970_v26 = vpack.c.bf16 %v958_v17, %v957_v13  ;;  %v964_v35 = vmax.f32 %v948_v29, 0.0 }
 0x382   : > { %v969_v22 = vpack.c.bf16 %v956_v12, %v955_v7  ;;  %v974_v40 = vpack.c.bf16 %v966_v38, %v965_v37 }
 0x383   : > { %982 = vst [vmem:[#allocation2 + $0x18] sm:$0xff] %v970_v26  ;;  %v973_v39 = vpack.c.bf16 %v964_v35, %v963_v31 }
 0x384   : > { %981 = vst [vmem:[#allocation2 + $0x10] sm:$0xff] %v969_v22  ;;  %986 = vst [vmem:[#allocation2 + $0x38] sm:$0xff] %v974_v40 }
 0x385   : > { %985 = vst [vmem:[#allocation2 + $0x30] sm:$0xff] %v973_v39 }
 0x386 PF: > { %p987_p12 = scmp.eq.s32.totalorder %s1866_s18, 2 }
 0x387   : > { %v992_v41 = vld [vmem:[%s2411_s4] sm:$0xff] (%p987_p12)  ;;  %v1031_v43 = vlaneseq (%p987_p12)  ;;  %v994_v44 = vld [vmem:[%s2411_s4 + $0x10] sm:$0xff] (%p987_p12)  ;;  %v993_v47 = vld [vmem:[%s2411_s4 + $0x8] sm:$0xff] (%p987_p12) }
 0x388   : > { %991 = sbr.rel (!%p987_p12) target bundleno = 1256 (0x4e8), region = 65  ;;  %v1378_v42 = vld [vmem:[%s2057_s12] ss:$0 sm:$0xff] (%p987_p12)  ;;  %v995_v48 = vld [vmem:[%s2411_s4 + $0x18] sm:$0xff] (%p987_p12)  ;;  %v1001_v3 = vld [vmem:[%s2411_s4 + $0x48] sm:$0xff] (%p987_p12) }
 0x389   : > { %v1015_v45 = vadd.f32 (%p987_p12), %v1378_v42, %v992_v41  ;;  %v1017_v46 = vadd.f32 (%p987_p12), %v1378_v42, %v994_v44  ;;  %v1032_v49 = vand.u32 (%p987_p12), 127, %v1031_v43  ;;  %v1016_v50 = vadd.f32 (%p987_p12), %v1378_v42, %v993_v47  ;;  %v998_v60 = vld [vmem:[%s2411_s4 + $0x30] sm:$0xff] (%p987_p12)  ;;  %v1000_v2 = vld [vmem:[%s2411_s4 + $0x40] sm:$0xff] (%p987_p12)  ;;  %v1003_v9 = vld [vmem:[%s2411_s4 + $0x58] sm:$0xff] (%p987_p12) }
 0x38a   : > { %v1018_v51 = vadd.f32 (%p987_p12), %v1378_v42, %v995_v48  ;;  %v996_v52 = vld [vmem:[%s2411_s4 + $0x20] sm:$0xff] (%p987_p12)  ;;  %v1021_v0 = vadd.f32 (%p987_p12), %v1378_v42, %v998_v60  ;;  %v1023_v6 = vadd.f32 (%p987_p12), %v1378_v42, %v1000_v2  ;;  %v1024_v7 = vadd.f32 (%p987_p12), %v1378_v42, %v1001_v3  ;;  %v1002_v8 = vld [vmem:[%s2411_s4 + $0x50] sm:$0xff] (%p987_p12) }
 0x38b   : > { %vm1033_vm0 = vcmp.lt.s32.totalorder (%p987_p12), %v1032_v49, 4  ;;  %v1019_v58 = vadd.f32 (%p987_p12), %v1378_v42, %v996_v52  ;;  %v999_v61 = vld [vmem:[%s2411_s4 + $0x38] sm:$0xff] (%p987_p12)  ;;  %v1025_v12 = vadd.f32 (%p987_p12), %v1378_v42, %v1002_v8  ;;  %v1026_v13 = vadd.f32 (%p987_p12), %v1378_v42, %v1003_v9  ;;  %v1004_v14 = vld [vmem:[%s2411_s4 + $0x60] sm:$0xff] (%p987_p12)  ;;  %v1006_v20 = vld [vmem:[%s2411_s4 + $0x70] sm:$0xff] (%p987_p12) }
 0x38c   : > { %v997_v53 = vld [vmem:[%s2411_s4 + $0x28] sm:$0xff] (%p987_p12)  ;;  %v1034_v54 = vsel (%p987_p12), %vm1033_vm0, %v1015_v45, -1e+30  ;;  %v1036_v55 = vsel (%p987_p12), %vm1033_vm0, %v1017_v46, -1e+30  ;;  %v1022_v1 = vadd.f32 (%p987_p12), %v1378_v42, %v999_v61  ;;  %v1027_v18 = vadd.f32 (%p987_p12), %v1378_v42, %v1004_v14  ;;  %v1007_v21 = vld [vmem:[%s2411_s4 + $0x78] sm:$0xff] (%p987_p12) }
 0x38d   : > { %1050 = vmax.xlane.f32.xlu0 (%p987_p12), %v1034_v54  ;;  %1054 = vmax.xlane.f32.xlu1 (%p987_p12), %v1036_v55  ;;  %v1035_v56 = vsel (%p987_p12), %vm1033_vm0, %v1016_v50, -1e+30  ;;  %v1037_v57 = vsel (%p987_p12), %vm1033_vm0, %v1018_v51, -1e+30  ;;  %v1020_v59 = vadd.f32 (%p987_p12), %v1378_v42, %v997_v53  ;;  %v1038_v62 = vsel (%p987_p12), %vm1033_vm0, %v1019_v58, -1e+30 }
 0x38e   : > { %v1040_v4 = vsel (%p987_p12), %vm1033_vm0, %v1021_v0, -1e+30  ;;  %v1041_v5 = vsel (%p987_p12), %vm1033_vm0, %v1022_v1, -1e+30  ;;  %v1042_v10 = vsel (%p987_p12), %vm1033_vm0, %v1023_v6, -1e+30  ;;  %v1029_v24 = vadd.f32 (%p987_p12), %v1378_v42, %v1006_v20 }
 0x38f   : > { %v1039_v63 = vsel %vm1033_vm0, %v1020_v59, -1e+30  ;;  %v1043_v11 = vsel %vm1033_vm0, %v1024_v7, -1e+30  ;;  %v1005_v15 = vld [vmem:[%s2411_s4 + $0x68] sm:$0xff]  ;;  %v1030_v25 = vadd.f32 %v1378_v42, %v1007_v21 }
 0x390   : > { %v2242_v16 = vsel %vm1033_vm0, %v1025_v12, -1e+30  ;;  %v2245_v17 = vsel %vm1033_vm0, %v1026_v13, -1e+30  ;;  %v1028_v19 = vadd.f32 %v1378_v42, %v1005_v15  ;;  %v2256_v22 = vsel %vm1033_vm0, %v1027_v18, -1e+30 }
 0x391   : > { %1052 = vmax.xlane.f32.xlu0 %v1035_v56  ;;  %1056 = vmax.xlane.f32.xlu1 %v1037_v57  ;;  %v2264_v26 = vsel %vm1033_vm0, %v1029_v24, -1e+30  ;;  %v2267_v27 = vsel %vm1033_vm0, %v1030_v25, -1e+30 }
 0x392   : > { %v2259_v23 = vsel %vm1033_vm0, %v1028_v19, -1e+30 }
 0x395   : > { %1058 = vmax.xlane.f32.xlu0 %v1038_v62  ;;  %1060 = vmax.xlane.f32.xlu1 %v1039_v63 }
 0x399   : > { %1062 = vmax.xlane.f32.xlu0 %v1040_v4  ;;  %1064 = vmax.xlane.f32.xlu1 %v1041_v5 }
 0x39d   : > { %1066 = vmax.xlane.f32.xlu0 %v1042_v10  ;;  %1068 = vmax.xlane.f32.xlu1 %v1043_v11 }
 0x3a1   : > { %1070 = vmax.xlane.f32.xlu0 %v2242_v16  ;;  %1072 = vmax.xlane.f32.xlu1 %v2245_v17 }
 0x3a5   : > { %1074 = vmax.xlane.f32.xlu0 %v2256_v22  ;;  %1076 = vmax.xlane.f32.xlu1 %v2259_v23 }
 0x3a9   : > { %1078 = vmax.xlane.f32.xlu0 %v2264_v26  ;;  %1080 = vmax.xlane.f32.xlu1 %v2267_v27 }
 0x41a   : > { %v1051_v28 = vpop.xlane.xlu0 %1050  ;;  %v1055_v29 = vpop.xlane.xlu1 %1054 }
 0x41b   : > { %v2271_v30 = vsub.f32 %v1034_v54, %v1051_v28  ;;  %v2273_v31 = vsub.f32 %v1036_v55, %v1055_v29 }
 0x41d   : > { %v1098_v32 = vmul.f32 1.442695, %v2271_v30  ;;  %v1102_v33 = vmul.f32 1.442695, %v2273_v31 }
 0x41e   : > { %v1053_v34 = vpop.xlane.xlu0 %1052  ;;  %v1057_v35 = vpop.xlane.xlu1 %1056 }
 0x41f   : > { %1674 = vpow2.f32 %v1098_v32  ;;  %v2277_v36 = vsub.f32 %v1035_v56, %v1053_v34  ;;  %v2279_v37 = vsub.f32 %v1037_v57, %v1057_v35 }
 0x420   : > { %1676 = vpow2.f32 %v1102_v33 }
 0x421   : > { %v1100_v38 = vmul.f32 1.442695, %v2277_v36  ;;  %v1104_v39 = vmul.f32 1.442695, %v2279_v37 }
 0x422   : > { %v1059_v40 = vpop.xlane.xlu0 %1058  ;;  %v1061_v41 = vpop.xlane.xlu1 %1060 }
 0x423   : > { %1678 = vpow2.f32 %v1100_v38  ;;  %v2283_v42 = vsub.f32 %v1038_v62, %v1059_v40  ;;  %v2285_v43 = vsub.f32 %v1039_v63, %v1061_v41 }
 0x424   : > { %1680 = vpow2.f32 %v1104_v39 }
 0x425   : > { %v1106_v44 = vmul.f32 1.442695, %v2283_v42  ;;  %v1108_v45 = vmul.f32 1.442695, %v2285_v43 }
 0x426   : > { %v1063_v46 = vpop.xlane.xlu0 %1062  ;;  %v1065_v47 = vpop.xlane.xlu1 %1064 }
 0x427   : > { %1682 = vpow2.f32 %v1106_v44  ;;  %v2289_v48 = vsub.f32 %v1040_v4, %v1063_v46  ;;  %v2291_v49 = vsub.f32 %v1041_v5, %v1065_v47 }
 0x428   : > { %1684 = vpow2.f32 %v1108_v45 }
 0x429   : > { %v1675_v50 = vpop.eup %1674  ;;  %v1110_v51 = vmul.f32 1.442695, %v2289_v48  ;;  %v1112_v52 = vmul.f32 1.442695, %v2291_v49 }
 0x42a   : > { %1130 = vadd.xlane.f32.xlu0 %v1675_v50  ;;  %v1067_v53 = vpop.xlane.xlu0 %1066  ;;  %v1069_v54 = vpop.xlane.xlu1 %1068 }
 0x42b   : > { %v1677_v55 = vpop.eup %1676  ;;  %1686 = vpow2.f32 %v1110_v51  ;;  %v2295_v56 = vsub.f32 %v1042_v10, %v1067_v53  ;;  %v2297_v57 = vsub.f32 %v1043_v11, %v1069_v54 }
 0x42c   : > { %1688 = vpow2.f32 %v1112_v52 }
 0x42d   : > { %v1679_v58 = vpop.eup %1678  ;;  %v1114_v59 = vmul.f32 1.442695, %v2295_v56  ;;  %v1116_v60 = vmul.f32 1.442695, %v2297_v57 }
 0x42e   : > { %1134 = vadd.xlane.f32.xlu0 %v1677_v55  ;;  %1132 = vadd.xlane.f32.xlu1 %v1679_v58  ;;  %v1071_v61 = vpop.xlane.xlu0 %1070  ;;  %v1073_v62 = vpop.xlane.xlu1 %1072 }
 0x42f   : > { %v1681_v63 = vpop.eup %1680  ;;  %1690 = vpow2.f32 %v1114_v59  ;;  %v2302_v0 = vsub.f32 %v2242_v16, %v1071_v61  ;;  %v2305_v1 = vsub.f32 %v2245_v17, %v1073_v62 }
 0x430   : > { %1692 = vpow2.f32 %v1116_v60 }
 0x431   : > { %v1683_v2 = vpop.eup %1682  ;;  %v1118_v3 = vmul.f32 1.442695, %v2302_v0  ;;  %v1120_v4 = vmul.f32 1.442695, %v2305_v1 }
 0x432   : > { %1136 = vadd.xlane.f32.xlu1 %v1681_v63  ;;  %1138 = vadd.xlane.f32.xlu0 %v1683_v2  ;;  %v1075_v5 = vpop.xlane.xlu0 %1074  ;;  %v1077_v6 = vpop.xlane.xlu1 %1076 }
 0x433   : > { %v1685_v7 = vpop.eup %1684  ;;  %1694 = vpow2.f32 %v1118_v3  ;;  %v2310_v8 = vsub.f32 %v2256_v22, %v1075_v5  ;;  %v2313_v9 = vsub.f32 %v2259_v23, %v1077_v6 }
 0x434   : > { %1696 = vpow2.f32 %v1120_v4 }
 0x435   : > { %v1687_v10 = vpop.eup %1686  ;;  %v1122_v11 = vmul.f32 1.442695, %v2310_v8  ;;  %v1124_v12 = vmul.f32 1.442695, %v2313_v9 }
 0x436   : > { %1140 = vadd.xlane.f32.xlu1 %v1685_v7  ;;  %1142 = vadd.xlane.f32.xlu0 %v1687_v10  ;;  %v1079_v13 = vpop.xlane.xlu0 %1078  ;;  %v1081_v14 = vpop.xlane.xlu1 %1080 }
 0x437   : > { %v1689_v15 = vpop.eup %1688  ;;  %1698 = vpow2.f32 %v1122_v11  ;;  %v2318_v16 = vsub.f32 %v2264_v26, %v1079_v13  ;;  %v2321_v17 = vsub.f32 %v2267_v27, %v1081_v14 }
 0x438   : > { %1700 = vpow2.f32 %v1124_v12 }
 0x439   : > { %v1691_v18 = vpop.eup %1690  ;;  %v1126_v19 = vmul.f32 1.442695, %v2318_v16  ;;  %v1128_v20 = vmul.f32 1.442695, %v2321_v17 }
 0x43a   : > { %1144 = vadd.xlane.f32.xlu1 %v1689_v15  ;;  %1146 = vadd.xlane.f32.xlu0 %v1691_v18  ;;  %v1693_v21 = vpop.eup %1692 }
 0x43b   : > { %1702 = vpow2.f32 %v1126_v19 }
 0x43c   : > { %1704 = vpow2.f32 %v1128_v20 }
 0x43d   : > { %v1695_v22 = vpop.eup %1694 }
 0x43e   : > { %1148 = vadd.xlane.f32.xlu1 %v1693_v21  ;;  %1150 = vadd.xlane.f32.xlu0 %v1695_v22  ;;  %v1697_v23 = vpop.eup %1696 }
 0x441   : > { %v1699_v24 = vpop.eup %1698 }
 0x442   : > { %1152 = vadd.xlane.f32.xlu1 %v1697_v23  ;;  %1154 = vadd.xlane.f32.xlu0 %v1699_v24  ;;  %v1701_v25 = vpop.eup %1700 }
 0x445   : > { %v1703_v26 = vpop.eup %1702 }
 0x446   : > { %1156 = vadd.xlane.f32.xlu1 %v1701_v25  ;;  %1158 = vadd.xlane.f32.xlu0 %v1703_v26  ;;  %v1705_v27 = vpop.eup %1704 }
 0x44a   : > { %1160 = vadd.xlane.f32.xlu1 %v1705_v27 }
 0x4b7   : > { %v1131_v28 = vpop.xlane.xlu0 %1130 }
 0x4b8   : > { %1706 = vlog2.f32 %v1131_v28 }
 0x4bb   : > { %v1133_v29 = vpop.xlane.xlu1 %1132  ;;  %v1135_v32 = vpop.xlane.xlu0 %1134 }
 0x4bc   : > { %1708 = vlog2.f32 %v1133_v29 }
 0x4bd   : > { %1710 = vlog2.f32 %v1135_v32 }
 0x4bf   : > { %v1137_v33 = vpop.xlane.xlu1 %1136  ;;  %v1139_v34 = vpop.xlane.xlu0 %1138 }
 0x4c0   : > { %1712 = vlog2.f32 %v1137_v33 }
 0x4c1   : > { %1714 = vlog2.f32 %v1139_v34 }
 0x4c2   : > { %v1707_v35 = vpop.eup %1706 }
 0x4c3   : > { %v1163_v38 = vmul.f32 0.6931472, %v1707_v35  ;;  %v1141_v39 = vpop.xlane.xlu1 %1140  ;;  %v1143_v40 = vpop.xlane.xlu0 %1142 }
 0x4c4   : > { %1716 = vlog2.f32 %v1141_v39 }
 0x4c5   : > { %v1194_v41 = vsub.f32 %v2271_v30, %v1163_v38  ;;  %1718 = vlog2.f32 %v1143_v40 }
 0x4c6   : > { %v1709_v44 = vpop.eup %1708 }
 0x4c7   : > { %v1711_v45 = vpop.eup %1710  ;;  %1210 = vst [vmem:[%s2411_s4] sm:$0xff] %v1194_v41  ;;  %v1165_v46 = vmul.f32 0.6931472, %v1709_v44  ;;  %v1145_v47 = vpop.xlane.xlu1 %1144 }
 0x4c8   : > { %v1147_v50 = vpop.xlane.xlu0 %1146  ;;  %v1167_v51 = vmul.f32 0.6931472, %v1711_v45  ;;  %1720 = vlog2.f32 %v1145_v47 }
 0x4c9   : > { %v1195_v52 = vsub.f32 %v2277_v36, %v1165_v46  ;;  %1722 = vlog2.f32 %v1147_v50 }
 0x4ca   : > { %v1713_v53 = vpop.eup %1712  ;;  %v1196_v54 = vsub.f32 %v2273_v31, %v1167_v51 }
 0x4cb   : > { %v1715_v55 = vpop.eup %1714  ;;  %1211 = vst [vmem:[%s2411_s4 + $0x8] sm:$0xff] %v1195_v52  ;;  %v1169_v30 = vmul.f32 0.6931472, %v1713_v53  ;;  %v1149_v58 = vpop.xlane.xlu1 %1148 }
 0x4cc   : > { %v1151_v59 = vpop.xlane.xlu0 %1150  ;;  %1212 = vst [vmem:[%s2411_s4 + $0x10] sm:$0xff] %v1196_v54  ;;  %v1171_v60 = vmul.f32 0.6931472, %v1715_v55  ;;  %1724 = vlog2.f32 %v1149_v58 }
 0x4cd   : > { %v1197_v36 = vsub.f32 %v2279_v37, %v1169_v30  ;;  %1726 = vlog2.f32 %v1151_v59 }
 0x4ce   : > { %v1717_v61 = vpop.eup %1716  ;;  %v1198_v31 = vsub.f32 %v2283_v42, %v1171_v60 }
 0x4cf   : > { %v1719_v62 = vpop.eup %1718  ;;  %1213 = vst [vmem:[%s2411_s4 + $0x18] sm:$0xff] %v1197_v36  ;;  %v1173_v63 = vmul.f32 0.6931472, %v1717_v61  ;;  %v1153_v2 = vpop.xlane.xlu1 %1152 }
 0x4d0   : > { %v1155_v3 = vpop.xlane.xlu0 %1154  ;;  %1214 = vst [vmem:[%s2411_s4 + $0x20] sm:$0xff] %v1198_v31  ;;  %v1175_v4 = vmul.f32 0.6931472, %v1719_v62  ;;  %1728 = vlog2.f32 %v1153_v2 }
 0x4d1   : > { %v1199_v37 = vsub.f32 %v2285_v43, %v1173_v63  ;;  %1730 = vlog2.f32 %v1155_v3 }
 0x4d2   : > { %v1721_v5 = vpop.eup %1720  ;;  %v1200_v42 = vsub.f32 %v2289_v48, %v1175_v4 }
 0x4d3   : > { %v1723_v6 = vpop.eup %1722  ;;  %1215 = vst [vmem:[%s2411_s4 + $0x28] sm:$0xff] %v1199_v37  ;;  %v1177_v7 = vmul.f32 0.6931472, %v1721_v5  ;;  %v1157_v10 = vpop.xlane.xlu1 %1156 }
 0x4d4   : > { %v1159_v11 = vpop.xlane.xlu0 %1158  ;;  %1216 = vst [vmem:[%s2411_s4 + $0x30] sm:$0xff] %v1200_v42  ;;  %v1179_v12 = vmul.f32 0.6931472, %v1723_v6  ;;  %1732 = vlog2.f32 %v1157_v10 }
 0x4d5   : > { %v1201_v43 = vsub.f32 %v2291_v49, %v1177_v7  ;;  %1734 = vlog2.f32 %v1159_v11 }
 0x4d6   : > { %v1725_v13 = vpop.eup %1724  ;;  %v1202_v48 = vsub.f32 %v2295_v56, %v1179_v12 }
 0x4d7   : > { %v1727_v14 = vpop.eup %1726  ;;  %1217 = vst [vmem:[%s2411_s4 + $0x38] sm:$0xff] %v1201_v43  ;;  %v1181_v15 = vmul.f32 0.6931472, %v1725_v13  ;;  %v1161_v18 = vpop.xlane.xlu1 %1160 }
 0x4d8   : > { %1218 = vst [vmem:[%s2411_s4 + $0x40] sm:$0xff] %v1202_v48  ;;  %v1183_v19 = vmul.f32 0.6931472, %v1727_v14  ;;  %1736 = vlog2.f32 %v1161_v18 }
 0x4d9   : > { %v1203_v20 = vsub.f32 %v2297_v57, %v1181_v15 }
 0x4da   : > { %v1729_v49 = vpop.eup %1728  ;;  %v1204_v21 = vsub.f32 %v2302_v0, %v1183_v19 }
 0x4db   : > { %v1731_v22 = vpop.eup %1730  ;;  %1219 = vst [vmem:[%s2411_s4 + $0x48] sm:$0xff] %v1203_v20  ;;  %v1185_v56 = vmul.f32 0.6931472, %v1729_v49 }
 0x4dc   : > { %1220 = vst [vmem:[%s2411_s4 + $0x50] sm:$0xff] %v1204_v21  ;;  %v1187_v23 = vmul.f32 0.6931472, %v1731_v22 }
 0x4dd   : > { %v1205_v24 = vsub.f32 %v2305_v1, %v1185_v56 }
 0x4de   : > { %v1733_v25 = vpop.eup %1732  ;;  %v1206_v26 = vsub.f32 %v2310_v8, %v1187_v23 }
 0x4df   : > { %v1735_v57 = vpop.eup %1734  ;;  %1221 = vst [vmem:[%s2411_s4 + $0x58] sm:$0xff] %v1205_v24  ;;  %v1189_v0 = vmul.f32 0.6931472, %v1733_v25 }
 0x4e0   : > { %1222 = vst [vmem:[%s2411_s4 + $0x60] sm:$0xff] %v1206_v26  ;;  %v1191_v27 = vmul.f32 0.6931472, %v1735_v57 }
 0x4e1   : > { %v1207_v28 = vsub.f32 %v2313_v9, %v1189_v0 }
 0x4e2   : > { %v1737_v29 = vpop.eup %1736  ;;  %v1208_v32 = vsub.f32 %v2318_v16, %v1191_v27 }
 0x4e3   : > { %1223 = vst [vmem:[%s2411_s4 + $0x68] sm:$0xff] %v1207_v28  ;;  %v1193_v1 = vmul.f32 0.6931472, %v1737_v29 }
 0x4e4   : > { %1224 = vst [vmem:[%s2411_s4 + $0x70] sm:$0xff] %v1208_v32 }
 0x4e5   : > { %v1209_v8 = vsub.f32 %v2321_v17, %v1193_v1 }
 0x4e7   : > { %1225 = vst [vmem:[%s2411_s4 + $0x78] sm:$0xff] %v1209_v8 }
 0x4e8 PF: > { %s18_s20 = sadd.s32 1, %s1874_s20   ;;  %s2424_s15 = smov %s1858_s16 }
 0x4e9   : > { %p15_p0 = scmp.ge.s32.totalorder %s18_s20, 5   ;;  %s2425_s16 = smov %s1862_s17 }
 0x4ea   : > { %s2426_s17 = smov %s1992_s30  ;;  %s2427_s18 = smov %s1870_s19 }
 0x4eb   : > { %s2428_s19 = smov %s2430_s28  ;;  %17 = sbr.rel (!%p15_p0) target bundleno = 5 (0x5), region = 112 }
 0x4f2   :  { %1248 = vsyncpa [#allocation6], 1 }
 0x4f3   :  { %1250 = vsyncpa [#allocation6 + $0x1], 1 }
 0x4f4   :  { %1251 = vsyncpa [#allocation8], 1 }
 0x4f5   :  { %1253 = vsyncpa [#allocation8 + $0x1], 1 }

</bundles_post_ra>
